<compile_context>
chip_gen: v7x
topology: tpu7x:2x2x1
jax: 0.10.0
libtpu: 0.0.40
codegen_flags: <defaults>
</compile_context>

<pallas_src>
import math
import numpy as np
import jax
import jax.numpy as jnp
from jax.experimental import pallas as pl
from jax.experimental.pallas import tpu as pltpu

MINVAR = -3.0
MAXVAR = -2.0


# ----------------------------------------------------------------------------
# Kernel 1: Radial weight sampling + KL reduction (lane-dense, tiled, KL accumulator)
# ----------------------------------------------------------------------------
def _weight_sample_kl_kernel(scale_ref, mu_ref, logsig_ref, pmu_ref, plogsig_ref, eps_ref,
                             w_ref, kl_ref):
    @pl.when(pl.program_id(0) == 0)
    def _init():
        kl_ref[...] = jnp.zeros_like(kl_ref)

    mu = mu_ref[...]
    logsig = logsig_ref[...]
    sigma = jnp.exp(0.5 * logsig)
    # Radial posterior sample: w = mu + sigma * eps * (r / ||eps||_global)
    # (the global norm is precomputed and passed as the SMEM scalar `scale_ref`)
    w_ref[...] = mu + sigma * eps_ref[...] * scale_ref[0, 0]

    pmu = pmu_ref[...]
    plogsig = plogsig_ref[...]
    # closed-form Gaussian KL contribution of this tile (zero-padded entries contribute 0)
    kl_part = 0.5 * jnp.sum(
        plogsig - logsig
        + (jnp.exp(logsig) + (mu - pmu) ** 2) * jnp.exp(-plogsig)
        - 1.0)
    kl_ref[...] += jnp.reshape(kl_part, (1, 1))


def sample_weight_and_kl(post_mu, post_logsigmasq, prior_mu, prior_logsigmasq, eps, r):
    shape = post_mu.shape                                   # (C_in, C_out, kH, kW)
    numel = int(np.prod(shape))
    LANES = 128

    rows = -(-numel // LANES)                               # ceil(numel / 128)
    TR = 512                                                # row-tile (sweepable)
    if rows <= TR:
        rows_pad = max(8, -(-rows // 8) * 8)                # single tile, sublane-aligned
        TR = rows_pad
    else:
        rows_pad = -(-rows // TR) * TR
    total = rows_pad * LANES

    def prep(a):
        a = jnp.reshape(a.astype(jnp.float32), (numel,))
        return jnp.pad(a, (0, total - numel)).reshape(rows_pad, LANES)

    mu2, ls2, pmu2, pls2, eps2 = (prep(a) for a in
                                  (post_mu, post_logsigmasq, prior_mu, prior_logsigmasq, eps))

    # hoist the global eps-norm out of the kernel (enables tiling / pipelining)
    scale = (r / jnp.sqrt(jnp.sum(eps.astype(jnp.float32) ** 2)))
    scale = jnp.reshape(scale, (1, 1)).astype(jnp.float32)

    vspec = pl.BlockSpec((TR, LANES), lambda i: (i, 0))
    w_pad, kl = pl.pallas_call(
        _weight_sample_kl_kernel,
        out_shape=(jax.ShapeDtypeStruct((rows_pad, LANES), jnp.float32),
                   jax.ShapeDtypeStruct((1, 1), jnp.float32)),
        grid=(rows_pad // TR,),
        in_specs=[pl.BlockSpec((1, 1), lambda i: (0, 0),
                               memory_space=pltpu.MemorySpace.SMEM),
                  vspec, vspec, vspec, vspec, vspec],
        out_specs=(vspec,
                   pl.BlockSpec((1, 1), lambda i: (0, 0))),   # resident KL accumulator
        compiler_params=pltpu.CompilerParams(
            dimension_semantics=("arbitrary",),
            vmem_limit_bytes=48 * 1024 * 1024),
    )(scale, mu2, ls2, pmu2, pls2, eps2)

    w = w_pad.reshape(-1)[:numel].reshape(shape)
    return w, kl[0, 0]


# ----------------------------------------------------------------------------
# Kernel 2: zero-free GEMM for the conv-transpose hot path
# ----------------------------------------------------------------------------
def _matmul_kernel(a_ref, b_ref, o_ref):
    o_ref[...] = jnp.dot(a_ref[...], b_ref[...], preferred_element_type=jnp.float32)


def conv_transpose2d_pallas(x, w, stride, padding, dilation):
    """ConvTranspose2d (groups=1). x: (N, C_in, H, W), w: (C_in, C_out, kH, kW).

    GEMM on the un-upsampled input: col[(n,h,w),(i,j,co)] = sum_ci x[n,ci,h,w] * w[ci,co,i,j]
    then a col2im scatter-add (static strided slices). Negative effective padding is handled
    naturally by the scatter clipping.
    """
    N, Cin, H, W = x.shape
    Cin_w, Cout, kH, kW = w.shape
    assert Cin == Cin_w
    sH, sW = stride
    pH, pW = padding
    dH, dW = dilation
    Hout = (H - 1) * sH - 2 * pH + dH * (kH - 1) + 1
    Wout = (W - 1) * sW - 2 * pW + dW * (kW - 1) + 1

    M = N * H * W                     # MXU row dimension (>= 128 for any realistic input)
    Kc = kH * kW * Cout               # lane dimension of the GEMM output

    # bf16 operands, f32 accumulation on the MXU
    x_mat = jnp.transpose(x, (0, 2, 3, 1)).reshape(M, Cin).astype(jnp.bfloat16)
    w_mat = jnp.transpose(w, (0, 2, 3, 1)).reshape(Cin, Kc).astype(jnp.bfloat16)

    TM = 256                                        # multiple of 128 (v5e) and 256 (v6e/v7x)
    M_pad = -(-M // TM) * TM
    Kc_128 = -(-Kc // 128) * 128
    TN = Kc_128 if Kc_128 <= 512 else 512           # lane-dense column tile, up to 512 wide
    Kc_pad = -(-Kc_128 // TN) * TN

    x_mat = jnp.pad(x_mat, ((0, M_pad - M), (0, 0)))
    w_mat = jnp.pad(w_mat, ((0, 0), (0, Kc_pad - Kc)))

    cost = pl.CostEstimate(
        flops=2 * M_pad * Cin * Kc_pad,
        transcendentals=0,
        bytes_accessed=x_mat.size * 2 + w_mat.size * 2 + M_pad * Kc_pad * 4)

    col = pl.pallas_call(
        _matmul_kernel,
        out_shape=jax.ShapeDtypeStruct((M_pad, Kc_pad), jnp.float32),
        grid=(M_pad // TM, Kc_pad // TN),
        in_specs=[pl.BlockSpec((TM, Cin), lambda i, j: (i, 0)),
                  pl.BlockSpec((Cin, TN), lambda i, j: (0, j))],
        out_specs=pl.BlockSpec((TM, TN), lambda i, j: (i, j)),
        compiler_params=pltpu.CompilerParams(
            dimension_semantics=("parallel", "parallel"),
            vmem_limit_bytes=48 * 1024 * 1024),
        cost_estimate=cost,
    )(x_mat, w_mat)

    col = col[:M, :Kc].reshape(N, H, W, kH, kW, Cout)

    # col2im scatter-add with static strided slices.
    # TODO(synk): the overlapping scatter-add stays in XLA glue; all FLOPs run in the Pallas GEMM.
    out_nhwc = jnp.zeros((N, Hout, Wout, Cout), jnp.float32)
    for i in range(kH):
        off_h = dH * i - pH
        h_lo = max(0, (-off_h + sH - 1) // sH)
        h_hi = min(H - 1, (Hout - 1 - off_h) // sH)
        if h_lo > h_hi:
            continue
        nh = h_hi - h_lo + 1
        oh_lo = h_lo * sH + off_h
        for j in range(kW):
            off_w = dW * j - pW
            w_lo = max(0, (-off_w + sW - 1) // sW)
            w_hi = min(W - 1, (Wout - 1 - off_w) // sW)
            if w_lo > w_hi:
                continue
            nw = w_hi - w_lo + 1
            ow_lo = w_lo * sW + off_w
            out_nhwc = out_nhwc.at[:, oh_lo:oh_lo + (nh - 1) * sH + 1:sH,
                                      ow_lo:ow_lo + (nw - 1) * sW + 1:sW, :].add(
                col[:, h_lo:h_hi + 1, w_lo:w_hi + 1, i, j, :])

    return jnp.transpose(out_nhwc, (0, 3, 1, 2))    # (N, C_out, Hout, Wout)


# ----------------------------------------------------------------------------
# Module wrapper (parameter setup = glue)
# ----------------------------------------------------------------------------
class BayesConvTranspose2d:
    def __init__(self, in_channels, out_channels, kernel_size, stride=1, padding=0,
                 dilation=1, groups=1, prior_mu=0.0, prior_logsigmasq=0.0,
                 key=jax.random.PRNGKey(0)):
        assert groups == 1  # TODO(synk): grouped conv-transpose not implemented in this kernel.
        _pair = lambda v: (v, v) if isinstance(v, int) else tuple(v)
        self.kernel_size = _pair(kernel_size)
        self.stride = _pair(stride)
        self.padding = _pair(padding)
        self.dilation = _pair(dilation)
        kH, kW = self.kernel_size

        n = in_channels * kH * kW
        stdv = 1.0 / math.sqrt(n)
        shape = (in_channels, out_channels, kH, kW)       # transposed conv weight shape
        k1, k2 = jax.random.split(key)
        self.post_mu = jax.random.uniform(k1, shape, jnp.float32, -stdv, stdv)
        self.post_logsigmasq = jax.random.uniform(k2, shape, jnp.float32, MINVAR, MAXVAR)
        self.prior_mu = jnp.zeros(shape, jnp.float32) + prior_mu
        self.prior_logsigmasq = jnp.zeros(shape, jnp.float32) + prior_logsigmasq
        # TODO(synk): bias=False and activation=None (module defaults); not exercised here.

    def sample(self, key):
        ke, kr = jax.random.split(key)
        eps = jax.random.normal(ke, self.post_mu.shape, jnp.float32)
        r = jax.random.normal(kr, (), jnp.float32)
        return sample_weight_and_kl(self.post_mu, self.post_logsigmasq,
                                    self.prior_mu, self.prior_logsigmasq, eps, r), (eps, r)

    def forward(self, x, key):
        (w, kl), _ = self.sample(key)
        out = conv_transpose2d_pallas(x, w, self.stride, self.padding, self.dilation)
        return out, kl


# ----------------------------------------------------------------------------
# Independent NumPy reference for conv_transpose2d (scatter formulation)
# ----------------------------------------------------------------------------
def conv_transpose2d_ref(x, w, stride, padding, dilation):
    x = np.asarray(x); w = np.asarray(w)
    N, Cin, H, W = x.shape
    _, Cout, kH, kW = w.shape
    sH, sW = stride; pH, pW = padding; dH, dW = dilation
    Hout = (H - 1) * sH - 2 * pH + dH * (kH - 1) + 1
    Wout = (W - 1) * sW - 2 * pW + dW * (kW - 1) + 1
    out = np.zeros((N, Cout, Hout, Wout), np.float32)
    for h in range(H):
        for ww in range(W):
            for i in range(kH):
                for j in range(kW):
                    y = h * sH - pH + dH * i
                    xo = ww * sW - pW + dW * j
                    if 0 <= y < Hout and 0 <= xo < Wout:
                        out[:, :, y, xo] += np.einsum('nc,cd->nd', x[:, :, h, ww], w[:, :, i, j])
    return out


if __name__ == "__main__":
    key = jax.random.PRNGKey(0)
    k_param, k_x, k_sample = jax.random.split(key, 3)

    in_channels, out_channels = 4, 8
    layer = BayesConvTranspose2d(in_channels, out_channels, kernel_size=3,
                                 stride=2, padding=1, key=k_param)

    x = jax.random.normal(k_x, (2, in_channels, 16, 16), jnp.float32)

    out, kl = layer.forward(x, k_sample)
    out = jax.block_until_ready(out)
    kl = jax.block_until_ready(kl)

    # --- correctness checks (silent) ---
    (w, kl2), (eps, r) = layer.sample(k_sample)
    w = jax.block_until_ready(w)

    # Radial sample reference
    sigma = jnp.exp(0.5 * layer.post_logsigmasq)
    w_ref = layer.post_mu + sigma * (eps / jnp.sqrt(jnp.sum(eps * eps))) * r
    np.testing.assert_allclose(np.asarray(w), np.asarray(w_ref), rtol=1e-5, atol=1e-5)

    # KL reference (closed-form Gaussian)
    kl_ref = 0.5 * jnp.sum(layer.prior_logsigmasq - layer.post_logsigmasq
                           + (jnp.exp(layer.post_logsigmasq)
                              + (layer.post_mu - layer.prior_mu) ** 2)
                           * jnp.exp(-layer.prior_logsigmasq) - 1.0)
    np.testing.assert_allclose(np.asarray(kl), np.asarray(kl_ref), rtol=1e-4, atol=1e-4)

    # conv-transpose reference (inputs rounded to bf16 to match the MXU operand precision)
    x_bf = np.asarray(x.astype(jnp.bfloat16).astype(jnp.float32))
    w_bf = np.asarray(w.astype(jnp.bfloat16).astype(jnp.float32))
    ref = conv_transpose2d_ref(x_bf, w_bf, layer.stride, layer.padding, layer.dilation)
    assert out.shape == ref.shape == (2, out_channels, 31, 31)
    np.testing.assert_allclose(np.asarray(out), ref, rtol=1e-4, atol=1e-4)

    print("KERNEL_OK")
</pallas_src>

<mosaic_0001>
module attributes {stable_mosaic.version = 11 : i64} {
  func.func @_weight_sample_kl_kernel(%arg0: i32, %arg1: memref<1x1xf32, #tpu.memory_space<smem>>, %arg2: memref<8x128xf32, #tpu.memory_space<vmem>>, %arg3: memref<8x128xf32, #tpu.memory_space<vmem>>, %arg4: memref<8x128xf32, #tpu.memory_space<vmem>>, %arg5: memref<8x128xf32, #tpu.memory_space<vmem>>, %arg6: memref<8x128xf32, #tpu.memory_space<vmem>>, %arg7: memref<8x128xf32, #tpu.memory_space<vmem>>, %arg8: memref<1x1xf32, #tpu.memory_space<vmem>>) attributes {dimension_semantics = [#tpu.dimension_semantics<arbitrary>], iteration_bounds = array<i64: 1>, scalar_prefetch = 0 : i64, scratch_operands = 0 : i64, tpu.core_type = #tpu.core_type<tc>, window_params = [{transform_indices = @transform_0, window_bounds = array<i64: 1, 1>}, {transform_indices = @transform_1, window_bounds = array<i64: 8, 128>}, {transform_indices = @transform_2, window_bounds = array<i64: 8, 128>}, {transform_indices = @transform_3, window_bounds = array<i64: 8, 128>}, {transform_indices = @transform_4, window_bounds = array<i64: 8, 128>}, {transform_indices = @transform_5, window_bounds = array<i64: 8, 128>}, {transform_indices = @transform_6, window_bounds = array<i64: 8, 128>}, {pipeline_mode = #tpu.pipeline_mode<synchronous>, transform_indices = @transform_7, window_bounds = array<i64: 1, 1>}]} {
    %c0_i32 = arith.constant 0 : i32
    %0 = arith.cmpi eq, %arg0, %c0_i32 : i32
    %1 = arith.extui %0 : i1 to i32
    %c0_i32_0 = arith.constant 0 : i32
    %2 = arith.cmpi ne, %1, %c0_i32_0 : i32
    scf.if %2 {
      %cst_22 = arith.constant 0.000000e+00 : f32
      %38 = vector.broadcast %cst_22 : f32 to vector<1x1xf32>
      %c0_23 = arith.constant 0 : index
      %c0_24 = arith.constant 0 : index
      %39 = vector.load %arg8[%c0_23, %c0_24] : memref<1x1xf32, #tpu.memory_space<vmem>>, vector<1x1xf32>
      tpu.vector_store %arg8[%c0_23, %c0_24], %38 {strides = array<i32>} : memref<1x1xf32, #tpu.memory_space<vmem>>, vector<1x1xf32>,
    } else {
    }
    %c0 = arith.constant 0 : index
    %c0_1 = arith.constant 0 : index
    %3 = vector.load %arg2[%c0, %c0_1] : memref<8x128xf32, #tpu.memory_space<vmem>>, vector<8x128xf32>
    %c0_2 = arith.constant 0 : index
    %c0_3 = arith.constant 0 : index
    %4 = vector.load %arg3[%c0_2, %c0_3] : memref<8x128xf32, #tpu.memory_space<vmem>>, vector<8x128xf32>
    %cst = arith.constant 5.000000e-01 : f32
    %5 = vector.broadcast %cst : f32 to vector<8x128xf32>
    %6 = arith.mulf %5, %4 : vector<8x128xf32>
    %7 = math.exp %6 : vector<8x128xf32>
    %c0_4 = arith.constant 0 : index
    %c0_5 = arith.constant 0 : index
    %8 = vector.load %arg6[%c0_4, %c0_5] : memref<8x128xf32, #tpu.memory_space<vmem>>, vector<8x128xf32>
    %9 = arith.mulf %7, %8 : vector<8x128xf32>
    %c0_6 = arith.constant 0 : index
    %c0_7 = arith.constant 0 : index
    %10 = memref.load %arg1[%c0_6, %c0_7] : memref<1x1xf32, #tpu.memory_space<smem>>
    %11 = vector.broadcast %10 : f32 to vector<8x128xf32>
    %12 = arith.mulf %9, %11 : vector<8x128xf32>
    %13 = arith.addf %3, %12 : vector<8x128xf32>
    %c0_8 = arith.constant 0 : index
    %c0_9 = arith.constant 0 : index
    %14 = vector.load %arg7[%c0_8, %c0_9] : memref<8x128xf32, #tpu.memory_space<vmem>>, vector<8x128xf32>
    tpu.vector_store %arg7[%c0_8, %c0_9], %13 {strides = array<i32>} : memref<8x128xf32, #tpu.memory_space<vmem>>, vector<8x128xf32>,
    %c0_10 = arith.constant 0 : index
    %c0_11 = arith.constant 0 : index
    %15 = vector.load %arg4[%c0_10, %c0_11] : memref<8x128xf32, #tpu.memory_space<vmem>>, vector<8x128xf32>
    %c0_12 = arith.constant 0 : index
    %c0_13 = arith.constant 0 : index
    %16 = vector.load %arg5[%c0_12, %c0_13] : memref<8x128xf32, #tpu.memory_space<vmem>>, vector<8x128xf32>
    %17 = arith.subf %16, %4 : vector<8x128xf32>
    %18 = math.exp %4 : vector<8x128xf32>
    %19 = arith.subf %3, %15 : vector<8x128xf32>
    %20 = arith.mulf %19, %19 : vector<8x128xf32>
    %21 = arith.addf %18, %20 : vector<8x128xf32>
    %cst_14 = arith.constant 0.000000e+00 : f32
    %22 = vector.broadcast %cst_14 : f32 to vector<8x128xf32>
    %23 = arith.subf %22, %16 : vector<8x128xf32>
    %24 = math.exp %23 : vector<8x128xf32>
    %25 = arith.mulf %21, %24 : vector<8x128xf32>
    %26 = arith.addf %17, %25 : vector<8x128xf32>
    %cst_15 = arith.constant 1.000000e+00 : f32
    %27 = vector.broadcast %cst_15 : f32 to vector<8x128xf32>
    %28 = arith.subf %26, %27 : vector<8x128xf32>
    %29 = vector.shape_cast %28 : vector<8x128xf32> to vector<1x8x128xf32>
    %cst_16 = arith.constant dense<0.000000e+00> : vector<1xf32>
    %30 = vector.multi_reduction <add>, %29, %cst_16 [1, 2] : vector<1x8x128xf32> to vector<1xf32>
    %31 = vector.shape_cast %30 : vector<1xf32> to vector<1x1x1xf32>
    %32 = vector.extract %31[0, 0, 0] : f32 from vector<1x1x1xf32>
    %cst_17 = arith.constant 5.000000e-01 : f32
    %33 = arith.mulf %cst_17, %32 : f32
    %c0_18 = arith.constant 0 : index
    %c0_19 = arith.constant 0 : index
    %34 = vector.load %arg8[%c0_18, %c0_19] : memref<1x1xf32, #tpu.memory_space<vmem>>, vector<1x1xf32>
    %35 = vector.broadcast %33 : f32 to vector<1x1xf32>
    %36 = arith.addf %34, %35 : vector<1x1xf32>
    %c0_20 = arith.constant 0 : index
    %c0_21 = arith.constant 0 : index
    %37 = vector.load %arg8[%c0_20, %c0_21] : memref<1x1xf32, #tpu.memory_space<vmem>>, vector<1x1xf32>
    tpu.vector_store %arg8[%c0_20, %c0_21], %36 {strides = array<i32>} : memref<1x1xf32, #tpu.memory_space<vmem>>, vector<1x1xf32>,
    return
  }
  func.func @transform_0(%arg0: i32) -> (i32, i32) {
    %c0_i32 = arith.constant 0 : i32
    %c0_i32_0 = arith.constant 0 : i32
    %c0_i32_1 = arith.constant 0 : i32
    return %c0_i32, %c0_i32_0 : i32, i32
  }
  func.func @transform_1(%arg0: i32) -> (i32, i32) {
    %c0_i32 = arith.constant 0 : i32
    %c0_i32_0 = arith.constant 0 : i32
    return %arg0, %c0_i32 : i32, i32
  }
  func.func @transform_2(%arg0: i32) -> (i32, i32) {
    %c0_i32 = arith.constant 0 : i32
    %c0_i32_0 = arith.constant 0 : i32
    return %arg0, %c0_i32 : i32, i32
  }
  func.func @transform_3(%arg0: i32) -> (i32, i32) {
    %c0_i32 = arith.constant 0 : i32
    %c0_i32_0 = arith.constant 0 : i32
    return %arg0, %c0_i32 : i32, i32
  }
  func.func @transform_4(%arg0: i32) -> (i32, i32) {
    %c0_i32 = arith.constant 0 : i32
    %c0_i32_0 = arith.constant 0 : i32
    return %arg0, %c0_i32 : i32, i32
  }
  func.func @transform_5(%arg0: i32) -> (i32, i32) {
    %c0_i32 = arith.constant 0 : i32
    %c0_i32_0 = arith.constant 0 : i32
    return %arg0, %c0_i32 : i32, i32
  }
  func.func @transform_6(%arg0: i32) -> (i32, i32) {
    %c0_i32 = arith.constant 0 : i32
    %c0_i32_0 = arith.constant 0 : i32
    return %arg0, %c0_i32 : i32, i32
  }
  func.func @transform_7(%arg0: i32) -> (i32, i32) {
    %c0_i32 = arith.constant 0 : i32
    %c0_i32_0 = arith.constant 0 : i32
    %c0_i32_1 = arith.constant 0 : i32
    return %c0_i32, %c0_i32_0 : i32, i32
  }
}

</mosaic_0001>

<bundles_post_ra>
// kernel: tpu_custom_call.1
= control target key start
LH: loop header
LB: loop body
LE: loop exit
PB: predicated region body
PF: predicated region fallthrough
CT: control target
= control target key end

     0   :  { %14 = vsyncpa [#allocation4], 0  ;;  %s390_s0 = inlined_call_operand.<no memory space> [shape: f32[1,1], index: 0, kind: input, shape index: {}]   ;;  %s391_s1 = inlined_call_operand.hbm [shape: f32[8,128], index: 1, kind: input, shape index: {}]   ;;  %s392_s2 = inlined_call_operand.hbm [shape: f32[8,128], index: 2, kind: input, shape index: {}]   ;;  %s393_s3 = inlined_call_operand.vmem [shape: f32[8,128], index: 3, kind: input, shape index: {}]   ;;  %s394_s4 = inlined_call_operand.hbm [shape: f32[8,128], index: 4, kind: input, shape index: {}]   ;;  %s395_s5 = inlined_call_operand.vmem [shape: f32[8,128], index: 5, kind: input, shape index: {}]   ;;  %s396_s6 = inlined_call_operand.hbm [shape: f32[8,128], index: 6, kind: output, shape index: {0}]   ;;  %s397_s7 = inlined_call_operand.hbm [shape: f32[1,1], index: 7, kind: output, shape index: {1}]  }
   0x1   :  { %15 = vsyncpa [#allocation7], 0 }
   0x2   :  { %16 = vsyncpa [#allocation5], 0 }
   0x3   :  { %17 = vsyncpa [#allocation11], 0  ;;  %s273_s24 = smov [#allocation6]   ;;  %s274_s26 = smov [#allocation3]  }
   0x4   :  { %s36_s25 = sshll.u32 %s273_s24, 4  ;;  %s26_s27 = sshll.u32 %s274_s26, 4  ;;  %s37_s25 = int_to_ptr.vmem [resolvable:$true] %s36_s25  ;;  %s27_s27 = int_to_ptr.vmem [resolvable:$true] %s26_s27 }
   0x5   :  { %s155_s30 = scalar_lea.hbm %s392_s2, 128 }
   0x6   :  { %p156_p0 = scmp.ne.s32.totalorder %s392_s2, %s155_s30  ;;  %p159_p1 = scmp.lt.u32.totalorder %s155_s30, %s392_s2 }
   0x8   :  { %p161_p2 = pnand %p159_p1, %p156_p0 }
   0xa   :  { %164 = shalt.err (!%p161_p2)
}
   0xb   :  { %s165_s12 = scalar_lea.vmem %s37_s25, 128  ;;  %p170_p4 = scmp.lt.s32.totalorder %s37_s25, %s37_s25 }
   0xc   :  { %p166_p3 = scmp.ne.s32.totalorder %s37_s25, %s165_s12  ;;  %p171_p5 = scmp.lt.s32.totalorder %s165_s12, %s165_s12 }
   0xe   :  { %p172_p6 = por %p171_p5, %p170_p4 }
  0x10   :  { %p173_p7 = pnand %p172_p6, %p166_p3 }
  0x12   :  { %176 = shalt.err (!%p173_p7)
}
  0x13   :  { %39 = dma.hbm_to_vmem [thread:$0]  %s392_s2, 128, %s37_s25, [#allocation7]  }
  0x14   :  { %s177_s17 = scalar_lea.hbm %s391_s1, 128 }
  0x15   :  { %p178_p8 = scmp.ne.s32.totalorder %s391_s1, %s177_s17  ;;  %p181_p9 = scmp.lt.u32.totalorder %s177_s17, %s391_s1 }
  0x17   :  { %p183_p10 = pnand %p181_p9, %p178_p8 }
  0x19   :  { %186 = shalt.err (!%p183_p10)
}
  0x1a   :  { %s187_s22 = scalar_lea.vmem %s27_s27, 128  ;;  %p192_p12 = scmp.lt.s32.totalorder %s27_s27, %s27_s27 }
  0x1b   :  { %p188_p11 = scmp.ne.s32.totalorder %s27_s27, %s187_s22  ;;  %p193_p13 = scmp.lt.s32.totalorder %s187_s22, %s187_s22 }
  0x1d   :  { %p194_p0 = por %p193_p13, %p192_p12 }
  0x1f   :  { %p195_p1 = pnand %p194_p0, %p188_p11 }
  0x21   :  { %198 = shalt.err (!%p195_p1)
}
  0x22   :  { %29 = dma.hbm_to_vmem [thread:$0]  %s391_s1, 128, %s27_s27, [#allocation4]  }
  0x23   :  { %s275_s24 = smov [#allocation8]   ;;  %s199_s29 = scalar_lea.hbm %s394_s4, 128 }
  0x24   :  { %s48_s25 = sshll.u32 %s275_s24, 4  ;;  %p200_p2 = scmp.ne.s32.totalorder %s394_s4, %s199_s29  ;;  %s49_s25 = int_to_ptr.vmem [resolvable:$true] %s48_s25 }
  0x25   :  { %p203_p3 = scmp.lt.u32.totalorder %s199_s29, %s394_s4 }
  0x27   :  { %p205_p4 = pnand %p203_p3, %p200_p2 }
  0x29   :  { %208 = shalt.err (!%p205_p4)
}
  0x2a   :  { %s209_s11 = scalar_lea.vmem %s49_s25, 128  ;;  %p214_p6 = scmp.lt.s32.totalorder %s49_s25, %s49_s25 }
  0x2b   :  { %p210_p5 = scmp.ne.s32.totalorder %s49_s25, %s209_s11  ;;  %p215_p7 = scmp.lt.s32.totalorder %s209_s11, %s209_s11 }
  0x2d   :  { %p216_p8 = por %p215_p7, %p214_p6 }
  0x2f   :  { %p217_p9 = pnand %p216_p8, %p210_p5 }
  0x31   :  { %220 = shalt.err (!%p217_p9)
}
  0x32   :  { %51 = dma.hbm_to_vmem [thread:$0]  %s394_s4, 128, %s49_s25, [#allocation7]  }
  0x33   :  { %265 = dma.done.wait [#allocation4], 128  }
  0x34   :  { %266 = vsyncadd [#allocation4], 4294967168 }
  0x35   :  { %267 = dma.done.wait [#allocation7], 256  }
  0x36   :  { %268 = vsyncadd [#allocation7], 4294967040  ;;  %vm67_vm0 = vcmask 0   ;;  %v276_v0 = vmov 0.0   ;;  %v70_v1 = vld [vmem:[#allocation6] sm:$0xff]  ;;  %v82_v2 = vld [vmem:[#allocation8] sm:$0xff]  ;;  %v77_v22 = vstv %s390_s0 }
  0x37   :  { %68 = vst.msk [vmem:[#allocation10] sm:$0x1] %vm67_vm0, %v276_v0  ;;  %v84_v3 = vmul.f32 1.442695, %v70_v1  ;;  %v89_v4 = vsub.f32 0.0, %v82_v2  ;;  %v69_v5 = vld [vmem:[#allocation3] sm:$0xff]  ;;  %v83_v12 = vsub.f32 %v82_v2, %v70_v1 }
  0x38   :  { %v81_v6 = vld [vmem:[%s393_s3] sm:$0xff]  ;;  %v71_v17 = vmul.f32 0.5, %v70_v1  ;;  %s277_s16 = smov [#allocation9]  }
  0x39   :  { %149 = vpow2.f32 %v84_v3  ;;  %v90_v7 = vmul.f32 1.442695, %v89_v4  ;;  %v86_v8 = vsub.f32 %v69_v5, %v81_v6  ;;  %v74_v20 = vld [vmem:[%s395_s5] sm:$0xff]  ;;  %s116_s17 = sshll.u32 %s277_s16, 4  ;;  %s117_s17 = int_to_ptr.vmem [resolvable:$true] %s116_s17 }
  0x3a   :  { %v72_v18 = vmul.f32 1.442695, %v71_v17  ;;  %s221_s18 = scalar_lea.vmem %s117_s17, 128  ;;  %p226_p11 = scmp.lt.s32.totalorder %s117_s17, %s117_s17 }
  0x3b   :  { %151 = vpow2.f32 %v90_v7  ;;  %v87_v9 = vmul.f32 %v86_v8, %v86_v8  ;;  %p222_p10 = scmp.ne.s32.totalorder %s117_s17, %s221_s18  ;;  %p227_p12 = scmp.lt.s32.totalorder %s221_s18, %s221_s18 }
  0x3c   :  { %153 = vpow2.f32 %v72_v18 }
  0x3d   :  { %p228_p13 = por %p227_p12, %p226_p11 }
  0x3f   :  { %p229_p0 = pnand %p228_p13, %p222_p10 }
  0x43   :  { %v150_v10 = vpop.eup %149 }
  0x44   :  { %v88_v11 = vadd.f32 %v150_v10, %v87_v9 }
  0x45   :  { %v152_v13 = vpop.eup %151 }
  0x46   :  { %v92_v14 = vmul.f32 %v152_v13, %v88_v11  ;;  %v154_v19 = vpop.eup %153 }
  0x47   :  { %v75_v21 = vmul.f32 %v154_v19, %v74_v20 }
  0x48   :  { %v93_v15 = vadd.f32 %v92_v14, %v83_v12 }
  0x49   :  { %v78_v23 = vmul.f32 %v77_v22, %v75_v21 }
  0x4a   :  { %v140_v16 = vadd.f32 -1.0, %v93_v15 }
  0x4b   :  { %v79_v24 = vadd.f32 %v78_v23, %v69_v5 }
  0x4c   :  { %95 = vadd.xlane.f32.xlu0 %v140_v16 }
  0x4d   :  { %80 = vst [vmem:[#allocation9] sm:$0xff] %v79_v24 }
  0x4e   :  { %232 = shalt.err (!%p229_p0)
}
  0x4f   :  { %s233_s20 = scalar_lea.hbm %s396_s6, 128 }
  0x50   :  { %p234_p1 = scmp.ne.s32.totalorder %s396_s6, %s233_s20  ;;  %p237_p2 = scmp.lt.u32.totalorder %s233_s20, %s396_s6 }
  0x52   :  { %p239_p3 = pnand %p237_p2, %p234_p1 }
  0x54   :  { %242 = shalt.err (!%p239_p3)
}
  0x55   :  { %119 = dma.vmem_to_hbm [thread:$0]  %s117_s17, 128, %s396_s6, [#allocation5]   ;;  %v105_v32 = vld [vmem:[#allocation10] sm:$0x1] }
  0x56   :  { %s278_s28 = smov [#allocation10]  }
  0x57   :  { %s126_s29 = sshll.u32 %s278_s28, 4  ;;  %s127_s29 = int_to_ptr.vmem [resolvable:$true] %s126_s29 }
  0x58   :  { %s243_s30 = scalar_lea.vmem %s127_s29, 16  ;;  %s247_s6 = scalar_lea.vmem %s127_s29, 32 }
  0x59   :  { %p244_p4 = scmp.ne.s32.totalorder %s127_s29, %s243_s30  ;;  %p248_p5 = scmp.lt.s32.totalorder %s127_s29, %s127_s29 }
  0x5a   :  { %p249_p6 = scmp.lt.s32.totalorder %s247_s6, %s243_s30 }
  0x5c   :  { %p250_p7 = por %p249_p6, %p248_p5 }
  0x5e   :  { %p251_p8 = pnand %p250_p7, %p244_p4 }
  0xd9   :  { %v96_v25 = vpop.xlane.xlu0 %95 }
  0xda   :  { %v97_v26 = vrot.slane %v96_v25, 4 }
  0xdc   :  { %v98_v27 = vadd.f32 %v97_v26, %v96_v25 }
  0xde   :  { %v99_v28 = vrot.slane %v98_v27, 2 }
  0xe0   :  { %v100_v29 = vadd.f32 %v99_v28, %v98_v27 }
  0xe2   :  { %v101_v30 = vrot.slane %v100_v29, 1 }
  0xe4   :  { %v102_v31 = vadd.f32 %v101_v30, %v100_v29 }
  0xe6   :  { %141 = vpush %v102_v31 }
 0x117   :  { %s142_s25 = spop %141 }
 0x118   :  { %s104_s26 = smul.f32 0.5, %s142_s25 }
 0x11a   :  { %v106_v33 = vstv %s104_s26 }
 0x11b   :  { %v107_v34 = vadd.f32 %v106_v33, %v105_v32 }
 0x11d   :  { %109 = vst.msk [vmem:[#allocation10] sm:$0x1] %vm67_vm0, %v107_v34 }
 0x11e   :  { %254 = shalt.err (!%p251_p8)
}
 0x11f   :  { %s255_s10 = scalar_lea.hbm %s397_s7, 16 }
 0x120   :  { %p256_p9 = scmp.ne.s32.totalorder %s397_s7, %s255_s10  ;;  %p259_p10 = scmp.lt.u32.totalorder %s255_s10, %s397_s7 }
 0x122   :  { %p261_p11 = pnand %p259_p10, %p256_p9 }
 0x124   :  { %264 = shalt.err (!%p261_p11)
}
 0x125   :  { %129 = dma.vmem_to_hbm [thread:$0]  %s127_s29, 16, %s397_s7, [#allocation11]  }
 0x126   :  { %269 = dma.done.wait [#allocation5], 128  }
 0x127   :  { %270 = vsyncadd [#allocation5], 4294967168 }
 0x128   :  { %271 = dma.done.wait [#allocation11], 16  }
 0x129   :  { %272 = vsyncadd [#allocation11], 4294967280 }
 0x12a   :  { %136 = vsyncpa [#allocation4], 1 }
 0x12b   :  { %137 = vsyncpa [#allocation7], 1 }
 0x12c   :  { %138 = vsyncpa [#allocation5], 1 }
 0x12d   :  { %139 = vsyncpa [#allocation11], 1 }

</bundles_post_ra>
